<compile_context>
chip_gen: v7x
topology: tpu7x:2x2x1
jax: 0.10.0
libtpu: 0.0.40
codegen_flags: <defaults>
</compile_context>

<pallas_src>
import functools

import jax
import jax.numpy as jnp
from jax.experimental import pallas as pl
from jax.experimental.pallas import tpu as pltpu


def _round_up(a, b):
    return -(-a // b) * b


def _ctrnn_kernel(x_ref, h_ref, w_in_ref, w_h_ref, b_ref, wfc_ref, bfc_ref,
                  out_ref, newh_ref, *, tau):
    """One row-tile of the fused CfC cell + linear head."""
    x = x_ref[...]
    h = h_ref[...]

    # pre = x @ W_in.T + h @ W_h.T + b   (two accumulating MXU dots, f32 accumulate)
    pre = (jnp.dot(x, w_in_ref[...], preferred_element_type=jnp.float32)
           + jnp.dot(h, w_h_ref[...], preferred_element_type=jnp.float32)
           + b_ref[...].astype(jnp.float32))

    if tau == 1.0:
        # h + (-1/1)*(h - tanh(pre)) == tanh(pre)  (saves two VPU ops / one live vreg)
        new_h = jnp.tanh(pre)
    else:
        hf = h.astype(jnp.float32)
        new_h = hf + (-1.0 / float(tau)) * (hf - jnp.tanh(pre))

    # fc head; cast to the (possibly bf16) weight dtype only for the MXU operand.
    out = (jnp.dot(new_h.astype(wfc_ref.dtype), wfc_ref[...],
                   preferred_element_type=jnp.float32)
           + bfc_ref[...].astype(jnp.float32))

    out_ref[...] = out.astype(out_ref.dtype)
    newh_ref[...] = new_h.astype(newh_ref.dtype)


def prepare_params(params, compute_dtype=jnp.float32):
    """One-time weight prep: transpose for x@W.T form and cast to the MXU dtype."""
    w_in = jnp.asarray(params["input_weights"])   # [H, I]
    w_h = jnp.asarray(params["hidden_weights"])   # [H, H]
    b = jnp.asarray(params["bias"])               # [H]
    w_fc = jnp.asarray(params["fc_weight"])       # [O, H]
    b_fc = jnp.asarray(params["fc_bias"])         # [O]

    hidden, in_size = w_in.shape
    out_size = w_fc.shape[0]

    return dict(
        w_in_t=w_in.T.astype(compute_dtype),          # [I, H]
        w_h_t=w_h.T.astype(compute_dtype),            # [H, H]
        bias=b.astype(jnp.float32).reshape(1, hidden),
        w_fc_t=w_fc.T.astype(compute_dtype),          # [H, O]
        b_fc=b_fc.astype(jnp.float32).reshape(1, out_size),
        in_size=in_size, hidden=hidden, out_size=out_size,
        compute_dtype=compute_dtype,
    )


def simple_ctrnn(x, hidden_state, prep, tau=1.0, row_tile=1024):
    """x: [B, T, input_size]; hidden_state: [B, T, hidden_size].

    Returns (output [B, T, output_size], new_hidden [B, T, hidden_size]),
    both in x.dtype.
    """
    B, T, in_size = x.shape
    hidden = prep["hidden"]
    out_size = prep["out_size"]
    assert in_size == prep["in_size"]
    assert hidden_state.shape == (B, T, hidden)

    compute_dtype = prep["compute_dtype"]
    out_dtype = x.dtype
    M = B * T

    # Flatten (B, T) -> M rows; cast activations to the MXU dtype in the wrapper so
    # the kernel's HBM reads are already halved when compute_dtype is bf16.
    xm = x.reshape(M, in_size).astype(compute_dtype)
    hm = hidden_state.reshape(M, hidden).astype(compute_dtype)

    # Row tile: big when M is big (fewer ~0.35us grid-step overheads), otherwise
    # split so there are >= 2 grid steps (both v7x TensorCores active). Always a
    # multiple of 8 (sublane).
    if M > row_tile:
        tm = row_tile
    else:
        tm = max(8, _round_up(pl.cdiv(M, 2), 8))
    grid_m = pl.cdiv(M, tm)   # Pallas masks the partial last block — no row padding.

    kernel = functools.partial(_ctrnn_kernel, tau=float(tau))

    act_b = jnp.dtype(compute_dtype).itemsize
    out_b = jnp.dtype(out_dtype).itemsize
    flops = 2 * M * hidden * (in_size + hidden + out_size)
    bytes_accessed = (M * (in_size + hidden) * act_b                     # x, h in
                      + (in_size + hidden + out_size) * hidden * act_b   # weights
                      + (hidden + out_size) * 4                          # biases
                      + M * (out_size + hidden) * out_b)                 # outputs

    out, new_h = pl.pallas_call(
        kernel,
        out_shape=(
            jax.ShapeDtypeStruct((M, out_size), out_dtype),
            jax.ShapeDtypeStruct((M, hidden), out_dtype),
        ),
        grid_spec=pltpu.PrefetchScalarGridSpec(
            num_scalar_prefetch=0,
            grid=(grid_m,),
            in_specs=[
                pl.BlockSpec((tm, in_size), lambda i: (i, 0)),       # x rows
                pl.BlockSpec((tm, hidden), lambda i: (i, 0)),        # h rows
                pl.BlockSpec((in_size, hidden), lambda i: (0, 0)),   # W_in.T (resident)
                pl.BlockSpec((hidden, hidden), lambda i: (0, 0)),    # W_h.T  (resident)
                pl.BlockSpec((1, hidden), lambda i: (0, 0)),         # bias
                pl.BlockSpec((hidden, out_size), lambda i: (0, 0)),  # W_fc.T (resident)
                pl.BlockSpec((1, out_size), lambda i: (0, 0)),       # b_fc
            ],
            out_specs=[
                pl.BlockSpec((tm, out_size), lambda i: (i, 0)),
                pl.BlockSpec((tm, hidden), lambda i: (i, 0)),
            ],
        ),
        compiler_params=pltpu.CompilerParams(
            dimension_semantics=("parallel",)),
        cost_estimate=pl.CostEstimate(flops=flops,
                                      transcendentals=M * hidden,
                                      bytes_accessed=bytes_accessed),
    )(xm, hm, prep["w_in_t"], prep["w_h_t"], prep["bias"],
      prep["w_fc_t"], prep["b_fc"])

    return out.reshape(B, T, out_size), new_h.reshape(B, T, hidden)


def _reference(x, hidden, params, tau=1.0):
    pre = (jnp.einsum("btk,hk->bth", x, params["input_weights"])
           + jnp.einsum("btk,hk->bth", hidden, params["hidden_weights"])
           + params["bias"])
    new_h = hidden + (-1.0 / tau) * (hidden - jnp.tanh(pre))
    out = jnp.einsum("bth,oh->bto", new_h, params["fc_weight"]) + params["fc_bias"]
    return out, new_h


if __name__ == "__main__":
    input_size, hidden_size, output_size = 10, 32, 8
    B, T = 5, 3  # matches torch.randn(5, 3, 10) in the source file

    key = jax.random.PRNGKey(0)
    k1, k2, k3, k4, k5, k6 = jax.random.split(key, 6)

    params = {
        "input_weights": jax.random.normal(k1, (hidden_size, input_size), jnp.float32),
        "hidden_weights": jax.random.normal(k2, (hidden_size, hidden_size), jnp.float32),
        "bias": jnp.zeros((hidden_size,), jnp.float32),
        # nn.Linear default init approximated deterministically (uniform in +-1/sqrt(H))
        "fc_weight": jax.random.uniform(k3, (output_size, hidden_size), jnp.float32,
                                        minval=-1.0 / hidden_size**0.5,
                                        maxval=1.0 / hidden_size**0.5),
        "fc_bias": jax.random.uniform(k4, (output_size,), jnp.float32,
                                      minval=-1.0 / hidden_size**0.5,
                                      maxval=1.0 / hidden_size**0.5),
    }

    x = jax.random.normal(k5, (B, T, input_size), jnp.float32)
    h0 = jax.random.normal(k6, (B, T, hidden_size), jnp.float32)

    # --- f32 path, tau = 1.0 (fast path) ---
    prep_f32 = prepare_params(params, compute_dtype=jnp.float32)
    out, new_h = simple_ctrnn(x, h0, prep_f32, tau=1.0)
    jax.block_until_ready((out, new_h))
    ref_out, ref_h = _reference(x, h0, params, tau=1.0)
    assert jnp.allclose(out, ref_out, atol=1e-4, rtol=1e-4)
    assert jnp.allclose(new_h, ref_h, atol=1e-4, rtol=1e-4)

    # --- f32 path, tau != 1.0 (general CfC update path) ---
    out2, new_h2 = simple_ctrnn(x, h0, prep_f32, tau=2.0)
    jax.block_until_ready((out2, new_h2))
    ref_out2, ref_h2 = _reference(x, h0, params, tau=2.0)
    assert jnp.allclose(out2, ref_out2, atol=1e-4, rtol=1e-4)
    assert jnp.allclose(new_h2, ref_h2, atol=1e-4, rtol=1e-4)

    # --- bf16 MXU path (optional perf mode): loose tolerance sanity check only ---
    prep_bf16 = prepare_params(params, compute_dtype=jnp.bfloat16)
    out3, new_h3 = simple_ctrnn(x, h0, prep_bf16, tau=1.0)
    jax.block_until_ready((out3, new_h3))
    assert jnp.allclose(out3, ref_out, atol=2.5e-1, rtol=1e-1)
    assert jnp.allclose(new_h3, ref_h, atol=2.5e-1, rtol=1e-1)

    print("KERNEL_OK")
</pallas_src>

<mosaic_0001>
module attributes {stable_mosaic.version = 11 : i64} {
  func.func @_ctrnn_kernel(%arg0: i32, %arg1: memref<8x10xf32, #tpu.memory_space<vmem>>, %arg2: memref<8x32xf32, #tpu.memory_space<vmem>>, %arg3: memref<10x32xf32, #tpu.memory_space<vmem>>, %arg4: memref<32x32xf32, #tpu.memory_space<vmem>>, %arg5: memref<1x32xf32, #tpu.memory_space<vmem>>, %arg6: memref<32x8xf32, #tpu.memory_space<vmem>>, %arg7: memref<1x8xf32, #tpu.memory_space<vmem>>, %arg8: memref<8x8xf32, #tpu.memory_space<vmem>>, %arg9: memref<8x32xf32, #tpu.memory_space<vmem>>) attributes {dimension_semantics = [#tpu.dimension_semantics<parallel>], iteration_bounds = array<i64: 2>, scalar_prefetch = 0 : i64, scratch_operands = 0 : i64, tpu.core_type = #tpu.core_type<tc>, window_params = [{transform_indices = @transform_0, window_bounds = array<i64: 8, 10>}, {transform_indices = @transform_1, window_bounds = array<i64: 8, 32>}, {pipeline_mode = #tpu.pipeline_mode<synchronous>, transform_indices = @transform_2, window_bounds = array<i64: 10, 32>}, {pipeline_mode = #tpu.pipeline_mode<synchronous>, transform_indices = @transform_3, window_bounds = array<i64: 32, 32>}, {pipeline_mode = #tpu.pipeline_mode<synchronous>, transform_indices = @transform_4, window_bounds = array<i64: 1, 32>}, {pipeline_mode = #tpu.pipeline_mode<synchronous>, transform_indices = @transform_5, window_bounds = array<i64: 32, 8>}, {pipeline_mode = #tpu.pipeline_mode<synchronous>, transform_indices = @transform_6, window_bounds = array<i64: 1, 8>}, {transform_indices = @transform_7, window_bounds = array<i64: 8, 8>}, {transform_indices = @transform_8, window_bounds = array<i64: 8, 32>}]} {
    %c0 = arith.constant 0 : index
    %c0_0 = arith.constant 0 : index
    %0 = vector.load %arg1[%c0, %c0_0] : memref<8x10xf32, #tpu.memory_space<vmem>>, vector<8x10xf32>
    %c0_1 = arith.constant 0 : index
    %c0_2 = arith.constant 0 : index
    %1 = vector.load %arg2[%c0_1, %c0_2] : memref<8x32xf32, #tpu.memory_space<vmem>>, vector<8x32xf32>
    %c0_3 = arith.constant 0 : index
    %c0_4 = arith.constant 0 : index
    %2 = vector.load %arg3[%c0_3, %c0_4] : memref<10x32xf32, #tpu.memory_space<vmem>>, vector<10x32xf32>
    %cst = arith.constant dense<0.000000e+00> : vector<8x32xf32>
    %3 = tpu.matmul %0, %2, %cst {dimension_numbers = #tpu.dot_dimension_numbers<[1], [0], [0], [1], [0, 0, 1, 1], [], []>} : vector<8x10xf32>, vector<10x32xf32>, vector<8x32xf32> -> vector<8x32xf32>
    %c0_5 = arith.constant 0 : index
    %c0_6 = arith.constant 0 : index
    %4 = vector.load %arg4[%c0_5, %c0_6] : memref<32x32xf32, #tpu.memory_space<vmem>>, vector<32x32xf32>
    %cst_7 = arith.constant dense<0.000000e+00> : vector<8x32xf32>
    %5 = tpu.matmul %1, %4, %cst_7 {dimension_numbers = #tpu.dot_dimension_numbers<[1], [0], [0], [1], [0, 0, 1, 1], [], []>} : vector<8x32xf32>, vector<32x32xf32>, vector<8x32xf32> -> vector<8x32xf32>
    %6 = arith.addf %3, %5 : vector<8x32xf32>
    %c0_8 = arith.constant 0 : index
    %c0_9 = arith.constant 0 : index
    %7 = vector.load %arg5[%c0_8, %c0_9] : memref<1x32xf32, #tpu.memory_space<vmem>>, vector<1x32xf32>
    %8 = vector.broadcast %7 : vector<1x32xf32> to vector<8x32xf32>
    %9 = arith.addf %6, %8 : vector<8x32xf32>
    %10 = math.tanh %9 : vector<8x32xf32>
    %c0_10 = arith.constant 0 : index
    %c0_11 = arith.constant 0 : index
    %11 = vector.load %arg6[%c0_10, %c0_11] : memref<32x8xf32, #tpu.memory_space<vmem>>, vector<32x8xf32>
    %cst_12 = arith.constant dense<0.000000e+00> : vector<8x8xf32>
    %12 = tpu.matmul %10, %11, %cst_12 {dimension_numbers = #tpu.dot_dimension_numbers<[1], [0], [0], [1], [0, 0, 1, 1], [], []>} : vector<8x32xf32>, vector<32x8xf32>, vector<8x8xf32> -> vector<8x8xf32>
    %c0_13 = arith.constant 0 : index
    %c0_14 = arith.constant 0 : index
    %13 = vector.load %arg7[%c0_13, %c0_14] : memref<1x8xf32, #tpu.memory_space<vmem>>, vector<1x8xf32>
    %14 = vector.broadcast %13 : vector<1x8xf32> to vector<8x8xf32>
    %15 = arith.addf %12, %14 : vector<8x8xf32>
    %c0_15 = arith.constant 0 : index
    %c0_16 = arith.constant 0 : index
    %16 = vector.load %arg8[%c0_15, %c0_16] : memref<8x8xf32, #tpu.memory_space<vmem>>, vector<8x8xf32>
    tpu.vector_store %arg8[%c0_15, %c0_16], %15 {strides = array<i32>} : memref<8x8xf32, #tpu.memory_space<vmem>>, vector<8x8xf32>,
    %c0_17 = arith.constant 0 : index
    %c0_18 = arith.constant 0 : index
    %17 = vector.load %arg9[%c0_17, %c0_18] : memref<8x32xf32, #tpu.memory_space<vmem>>, vector<8x32xf32>
    tpu.vector_store %arg9[%c0_17, %c0_18], %10 {strides = array<i32>} : memref<8x32xf32, #tpu.memory_space<vmem>>, vector<8x32xf32>,
    return
  }
  func.func @transform_0(%arg0: i32) -> (i32, i32) {
    %c0_i32 = arith.constant 0 : i32
    %c0_i32_0 = arith.constant 0 : i32
    return %arg0, %c0_i32 : i32, i32
  }
  func.func @transform_1(%arg0: i32) -> (i32, i32) {
    %c0_i32 = arith.constant 0 : i32
    %c0_i32_0 = arith.constant 0 : i32
    return %arg0, %c0_i32 : i32, i32
  }
  func.func @transform_2(%arg0: i32) -> (i32, i32) {
    %c0_i32 = arith.constant 0 : i32
    %c0_i32_0 = arith.constant 0 : i32
    %c0_i32_1 = arith.constant 0 : i32
    return %c0_i32, %c0_i32_0 : i32, i32
  }
  func.func @transform_3(%arg0: i32) -> (i32, i32) {
    %c0_i32 = arith.constant 0 : i32
    %c0_i32_0 = arith.constant 0 : i32
    %c0_i32_1 = arith.constant 0 : i32
    return %c0_i32, %c0_i32_0 : i32, i32
  }
  func.func @transform_4(%arg0: i32) -> (i32, i32) {
    %c0_i32 = arith.constant 0 : i32
    %c0_i32_0 = arith.constant 0 : i32
    %c0_i32_1 = arith.constant 0 : i32
    return %c0_i32, %c0_i32_0 : i32, i32
  }
  func.func @transform_5(%arg0: i32) -> (i32, i32) {
    %c0_i32 = arith.constant 0 : i32
    %c0_i32_0 = arith.constant 0 : i32
    %c0_i32_1 = arith.constant 0 : i32
    return %c0_i32, %c0_i32_0 : i32, i32
  }
  func.func @transform_6(%arg0: i32) -> (i32, i32) {
    %c0_i32 = arith.constant 0 : i32
    %c0_i32_0 = arith.constant 0 : i32
    %c0_i32_1 = arith.constant 0 : i32
    return %c0_i32, %c0_i32_0 : i32, i32
  }
  func.func @transform_7(%arg0: i32) -> (i32, i32) {
    %c0_i32 = arith.constant 0 : i32
    %c0_i32_0 = arith.constant 0 : i32
    return %arg0, %c0_i32 : i32, i32
  }
  func.func @transform_8(%arg0: i32) -> (i32, i32) {
    %c0_i32 = arith.constant 0 : i32
    %c0_i32_0 = arith.constant 0 : i32
    return %arg0, %c0_i32 : i32, i32
  }
}

</mosaic_0001>

<bundles_post_ra>
// kernel: tpu_custom_call.1
= control target key start
LH: loop header
LB: loop body
LE: loop exit
PB: predicated region body
PF: predicated region fallthrough
CT: control target
= control target key end

     0   :  { %14 = vsyncpa [#allocation3], 0  ;;  %s1334_s0 = inlined_call_operand.vmem [shape: f32[15,10], index: 0, kind: input, shape index: {}]   ;;  %s1335_s1 = inlined_call_operand.hbm [shape: f32[15,32], index: 1, kind: input, shape index: {}]   ;;  %s1336_s2 = inlined_call_operand.hbm [shape: f32[10,32], index: 2, kind: input, shape index: {}]   ;;  %s1337_s3 = inlined_call_operand.vmem [shape: f32[32,32], index: 3, kind: input, shape index: {}]   ;;  %s1338_s4 = inlined_call_operand.vmem [shape: f32[1,32], index: 4, kind: input, shape index: {}]   ;;  %s1339_s5 = inlined_call_operand.vmem [shape: f32[32,8], index: 5, kind: input, shape index: {}]   ;;  %s1340_s6 = inlined_call_operand.vmem [shape: f32[1,8], index: 6, kind: input, shape index: {}]   ;;  %s1341_s7 = inlined_call_operand.vmem [shape: f32[15,8], index: 7, kind: output, shape index: {0}]   ;;  %s1342_s8 = inlined_call_operand.hbm [shape: f32[15,32], index: 8, kind: output, shape index: {1}]  }
   0x1   :  { %16 = vsyncpa [#allocation3 + $0x1], 0 }
   0x2   :  { %17 = vsyncpa [#allocation6], 0 }
   0x3   :  { %18 = vsyncpa [#allocation4], 0 }
   0x4   :  { %20 = vsyncpa [#allocation4 + $0x1], 0  ;;  %s1086_s27 = smov 0   ;;  %s1088_s28 = smov 0  }
   0x5   :  { %s1090_s29 = smov 0   ;;  %s1092_s30 = smov 0  }
   0x6 LB: > { %s1107_s9 = sadd.s32 4294967295, %s1030_s30   ;;  %s757_s10 = sadd.s32 4294967294, %s1030_s30   ;;  %s1030_s30 = sphi %s1092_s30, %s1362_s30   ;;  %s1026_s29 = sphi %s1090_s29, %s1365_s29   ;;  %s1022_s28 = sphi %s1088_s28, %s1364_s28   ;;  %s1018_s27 = sphi %s1086_s27, %s1363_s27  }
   0x7   : > { %p72_p0 = scmp.ne.s32.totalorder %s1022_s28, %s1018_s27  ;;  %p1343_p1 = scmp.eq.s32.totalorder %s1107_s9, 0 }
   0x8   : > { %p233_p3 = scmp.eq.s32.totalorder %s757_s10, 1  ;;  %p758_p5 = scmp.ge.s32.totalorder %s1030_s30, 1 }
   0x9   : > { %p1116_p4 = por %p1343_p1, %p72_p0  ;;  %p240_p7 = scmp.lt.s32.totalorder %s1030_s30, 3 }
   0xa   : > { %p1121_p6 = por %p233_p3, %p72_p0  ;;  %s1032_s14 = smov [#allocation5]  }
   0xb   : > { %s1348_s11 = scalar_select %p1116_p4, 1, 0 }
   0xc   : > { %s1349_s12 = scalar_select %p1121_p6, 1, 0 }
   0xd   : > { %p1126_p8 = pnand %p758_p5, %p240_p7  ;;  %s252_s15 = sshll.u32 %s1032_s14, 4  ;;  %s1130_s15 = int_to_ptr.vmem [resolvable:$true] %s252_s15 }
   0xe   : > { %s1142_s17 = sadd.s32 1, %s1030_s30   ;;  %s59_s18 = sadd.s32 1, %s1026_s29 }
   0xf   : > { %s1350_s13 = scalar_select %p1126_p8, 1, 0 }
  0x10   : > { %p845_p9 = pneg %p1126_p8  ;;  %1352 = sst [smem:[#allocation11_spill]] %s1142_s17 }
  0x11   : > { %s56_s19 = ssub.s32 %s1030_s30, %s1142_s17  ;;  %s902_s22 = scalar_lea.hbm %s1336_s2, 256 }
  0x12   : > { %p1137_p11 = pnand %p845_p9, %p1343_p1  ;;  %p903_p12 = scmp.ne.s32.totalorder %s1336_s2, %s902_s22 }
  0x13   : > { %p909_p5 = scmp.lt.u32.totalorder %s902_s22, %s1336_s2 }
  0x14   : > { %p904_p13 = pneg %p1137_p11 }
  0x16   : > { %p905_p0 = pnand %p904_p13, %p903_p12 }
  0x18   : > { %p906_p3 = pneg %p905_p0 }
  0x1a   : > { %p911_p7 = pnand %p909_p5, %p906_p3 }
  0x1c   : > { %914 = shalt.err (!%p911_p7)
}
  0x1d   : > { %s915_s10 = scalar_lea.vmem %s1130_s15, 256  ;;  %p923_p2 = scmp.lt.s32.totalorder %s1130_s15, %s1130_s15 }
  0x1e   : > { %p916_p9 = scmp.ne.s32.totalorder %s1130_s15, %s915_s10  ;;  %p924_p6 = scmp.lt.s32.totalorder %s915_s10, %s915_s10 }
  0x20   : > { %p918_p10 = pnand %p916_p9, %p904_p13  ;;  %p925_p4 = por %p924_p6, %p923_p2 }
  0x22   : > { %p919_p1 = pneg %p918_p10 }
  0x24   : > { %p926_p8 = pnand %p925_p4, %p919_p1 }
  0x26   : > { %929 = shalt.err (!%p926_p8)
}
  0x27   : > { %s1033_s14 = smov 128   ;;  %s1034_s20 = smov 8  }
  0x28   : > { %848 = dma.hbm_to_vmem [thread:$0]  (!%p1137_p11), %s1336_s2, 256, %s1130_s15, [#allocation6], %s1033_s14, %s1033_s14, %s1034_s20  }
  0x29   : > { %p57_p2 = scmp.eq.s32.totalorder %s56_s19, 0  ;;  %p66_p1 = scmp.ne.s32.totalorder %s1026_s29, %s1022_s28 }
  0x2a   : > { %p67_p4 = scmp.eq.s32.totalorder %s1030_s30, 0  ;;  %p858_p6 = scmp.lt.s32.totalorder %s1030_s30, 2 }
  0x2b   : > { %s1173_s23 = scalar_select %p57_p2, %s1026_s29, %s59_s18  }
  0x2c   : > { %p68_p8 = por %p67_p4, %p66_p1  ;;  %p1353_p10 = scmp.eq.s32.totalorder %s1107_s9, 1 }
  0x2d   : > { %s285_s25 = sand.u32 1, %s1026_s29   ;;  %s762_s26 = sshll.u32 %s1030_s30, 7 }
  0x2e   : > { %p1177_p12 = por %p1353_p10, %p66_p1  ;;  %s761_s10 = sshll.u32 %s285_s25, 3 }
  0x2f   : > { %s1186_s21 = scalar_lea.hbm %s1335_s1, %s762_s26  ;;  %s289_s15 = scalar_lea.vmem [#allocation2], %s761_s10 }
  0x30   : > { %s296_s18 = sshll.u32 %s289_s15, 4  ;;  %p1188_p11 = pnand %p858_p6, %p68_p8  ;;  %s1192_s18 = int_to_ptr.vmem [resolvable:$true] %s296_s18 }
  0x31   : > { %s286_s14 = scalar_lea.sflag [#allocation3], %s285_s25  ;;  %s930_s20 = scalar_lea.hbm %s1186_s21, 128 }
  0x32   : > { %p931_p13 = scmp.ne.s32.totalorder %s1186_s21, %s930_s20  ;;  %p932_p0 = pneg %p1188_p11 }
  0x33   : > { %s935_s26 = scalar_lea.hbm %s1335_s1, 256  ;;  %p936_p7 = scmp.lt.u32.totalorder %s1186_s21, %s1335_s1 }
  0x34   : > { %p933_p3 = pnand %p932_p0, %p931_p13  ;;  %p937_p9 = scmp.lt.u32.totalorder %s935_s26, %s930_s20 }
  0x35   : > { %p939_p1 = scmp.lt.u32.totalorder %s930_s20, %s1186_s21 }
  0x36   : > { %p934_p5 = pneg %p933_p3  ;;  %p938_p2 = por %p937_p9, %p936_p7 }
  0x38   : > { %p940_p4 = por %p939_p1, %p938_p2 }
  0x3a   : > { %p941_p6 = pnand %p940_p4, %p934_p5 }
  0x3c   : > { %944 = shalt.err (!%p941_p6)
}
  0x3d   : > { %s945_s25 = scalar_lea.vmem %s1192_s18, 128  ;;  %s1035_s15 = smov [#allocation2]  }
  0x3e   : > { %p946_p8 = scmp.ne.s32.totalorder %s1192_s18, %s945_s25  ;;  %s950_s17 = sshll.u32 %s1035_s15, 4  ;;  %s951_s17 = int_to_ptr.vmem [resolvable:$false] %s950_s17 }
  0x3f   : > { %s952_s22 = scalar_lea.vmem %s951_s17, 256  ;;  %p953_p3 = scmp.lt.s32.totalorder %s1192_s18, %s951_s17 }
  0x40   : > { %p948_p10 = pnand %p946_p8, %p932_p0  ;;  %p954_p7 = scmp.lt.s32.totalorder %s952_s22, %s945_s25 }
  0x42   : > { %p949_p13 = pneg %p948_p10  ;;  %p955_p9 = por %p954_p7, %p953_p3 }
  0x44   : > { %p956_p2 = pnand %p955_p9, %p949_p13 }
  0x46   : > { %959 = shalt.err (!%p956_p2)
}
  0x47   : > { %852 = dma.hbm_to_vmem [thread:$0]  (!%p1188_p11), %s1186_s21, 128, %s1192_s18, %s286_s14  }
  0x48   : > { %p1356_p5 = scmp.ne.s32.totalorder %s1350_s13, 0 }
  0x49   : > { %s1222_s20 = sand.u32 (!%p1356_p5), 1, %s1022_s28   ;;  %p1357_p0 = scmp.ne.s32.totalorder (!%p1356_p5), %s1348_s11, 0 }
  0x4a   : > { %305 = sbr.rel (%p1356_p5) target bundleno = 538 (0x21a), region = 48  ;;  %s764_s26 = sshll.u32 (!%p1356_p5), %s1222_s20, 3 }
  0x4b   : > { %s308_s10 = scalar_lea.sflag (!%p1356_p5), [#allocation3], %s1222_s20  ;;  %s1228_s16 = scalar_lea.vmem (!%p1356_p5), [#allocation2], %s764_s26 }
  0x51   : > { %1005 = dma.done.wait (%p1357_p0), %s308_s10, 128  }
  0x52   : > { %1007 = vsyncadd (%p1357_p0), %s308_s10, 4294967168  ;;  %p1358_p11 = scmp.eq.s32.totalorder %s1107_s9, 0 }
  0x54   : > { %1009 = dma.done.wait (%p1358_p11), [#allocation6], 256   ;;  %p1359_p1 = pmov %p1358_p11 }
  0x55   : > { %v1036_v0 = vmov 0.0|0.0   ;;  %p356_p4 = scmp.lt.s32.totalorder %s1107_s9, 1  ;;  %vm1037_vm0 = vmmov 0   ;;  %v1038_v1 = vmov 0.0   ;;  %vm450_vm1 = vcmask 1041408   ;;  %v368_v2 = vld [vmem:[%s1337_s3] sm:$0xff] }
  0x56   : > { %1011 = vsyncadd (%p1359_p1), [#allocation6], 4294967040  ;;  %821 = vmatprep.subr.bf16.mxu0 %v1036_v0  ;;  %827 = vmatprep.subr.bf16.mxu1 %v1036_v0  ;;  %vm1039_vm2 = vmmov 1   ;;  %v369_v3 = vld [vmem:[%s1337_s3 + $0x8] sm:$0xff]  ;;  %v366_v4 = vld [vmem:[#allocation5] sm:$0xff]  ;;  %vm446_vm4 = vcmask 80896  }
  0x57   : > { %807 = vmatprep.mubr.msk.f32.mxu1 %vm1037_vm0, %v1038_v1  ;;  %800 = vmatprep.mubr.msk.f32.mxu0 %vm1037_vm0, %v1038_v1  ;;  %s1242_s11 = scalar_select %p356_p4, %s1107_s9, 1  ;;  %vm829_vm3 = vmpackc.low %vm450_vm1, %vm1039_vm2  ;;  %v822_v5 = vpack.c.bf16 %v369_v3, %v368_v2  ;;  %v367_v6 = vld [vmem:[#allocation5 + $0x8] sm:$0x3]  ;;  %v370_v7 = vld [vmem:[%s1337_s3 + $0x10] sm:$0xff]  ;;  %vm372_vm5 = vcmask 261120  }
  0x58   : > { %v371_v8 = vld [vmem:[%s1337_s3 + $0x18] sm:$0xff]  ;;  %v828_v9 = vpack.c.bf16 %v367_v6, %v366_v4  ;;  %v365_v12 = vld [vmem:[%s1228_s16] sm:$0xff]  ;;  %v535_v15 = vld [vmem:[%s1339_s5 + $0x10] sm:$0xff]  ;;  %s355_s19 = scalar_lea.vmem [#allocation7], %s764_s26  ;;  %s776_s14 = sshll.u32 %s1107_s9, 7 }
  0x59   : > { %s767_s13 = sshll.u32 %s1242_s11, 3  ;;  %823 = vmatpush3.bf16.msra.mxu0 %v822_v5  ;;  %v825_v10 = vpack.c.bf16 %v371_v8, %v370_v7  ;;  %v533_v13 = vld [vmem:[%s1339_s5] sm:$0xff]  ;;  %v534_v14 = vld [vmem:[%s1339_s5 + $0x8] sm:$0xff]  ;;  %v536_v17 = vld [vmem:[%s1339_s5 + $0x18] sm:$0xff]  ;;  %s641_s25 = sshll.u32 %s355_s19, 4  ;;  %s642_s25 = int_to_ptr.vmem [resolvable:$true] %s641_s25 }
  0x5a   : > { %s359_s18 = scalar_lea.vmem %s1334_s0, %s767_s13  ;;  %824 = vmatprep.subr.bf16.mxu0 %v1036_v0  ;;  %830 = vmatpush3.bf16.msk.msra.mxu1 %vm829_vm3, %v828_v9  ;;  %v832_v16 = vpack.c.bf16 %v534_v14, %v533_v13  ;;  %v835_v18 = vpack.c.bf16 %v536_v17, %v535_v15  ;;  %v772_v22 = vld [vmem:[%s1338_s4] ss:$0 sm:$0xff]  ;;  %s1288_s22 = scalar_lea.hbm %s1342_s8, %s776_s14 }
  0x5b   : > { %v364_v11 = vld [vmem:[%s359_s18] sm:$0xff]  ;;  %831 = vmatprep.subr.bf16.mxu1 %v1036_v0  ;;  %s625_s10 = scalar_lea.sflag [#allocation4], %s1222_s20  ;;  %s960_s16 = scalar_lea.vmem %s642_s25, 128 }
  0x5c   : > { %p961_p6 = scmp.ne.s32.totalorder %s642_s25, %s960_s16  ;;  %s1040_s21 = smov [#allocation7]  }
  0x5d   : > { %826 = vmatpush3.bf16.msra.mxu0 %v825_v10  ;;  %808 = vmatmul.mubr.msk.f32.vlgmr.msra.gmra.mrb[0].mxu1 %vm446_vm4, %v364_v11  ;;  %s964_s18 = sshll.u32 %s1040_s21, 4  ;;  %s965_s18 = int_to_ptr.vmem [resolvable:$false] %s964_s18 }
  0x5e   : > { %818 = vmatprep.mubr.msk.f32.mxu1 %vm1037_vm0, %v1038_v1  ;;  %833 = vmatpush3.bf16.msra.mxu1 %v832_v16  ;;  %p962_p8 = pnand %p961_p6, %p1177_p12  ;;  %s966_s26 = scalar_lea.vmem %s965_s18, 256 }
  0x5f   : > { %834 = vmatprep.subr.bf16.mxu1 %v1036_v0  ;;  %p967_p13 = scmp.lt.s32.totalorder %s642_s25, %s965_s18  ;;  %p968_p3 = scmp.lt.s32.totalorder %s966_s26, %s960_s16 }
  0x60   : > { %801 = vmatmul.mubr.msk.f32.vlgmr.msra.gmra.mrb[0].mxu0 %vm372_vm5, %v365_v12  ;;  %p963_p10 = pneg %p962_p8 }
  0x61   : > { %p969_p7 = por %p968_p3, %p967_p13 }
  0x62   : > { %836 = vmatpush3.bf16.msra.mxu1 %v835_v18 }
  0x63   : > { %p970_p9 = pnand %p969_p7, %p963_p10 }
 0x130   : > { %v520_v19 = vpop.f32.mrb[0].mxu1 }
 0x131   : > { %v809_v20 = vpop.f32.mrb[1].mxu1 }
 0x133   : > { %v442_v21 = vpop.f32.mrb[0].mxu0 }
 0x134   : > { %v521_v23 = vadd.f32 %v520_v19, %v442_v21  ;;  %v802_v24 = vpop.f32.mrb[1].mxu0 }
 0x136   : > { %v531_v25 = vadd.f32 %v772_v22, %v521_v23 }
 0x138   : > { %900 = vtanh.f32 %v531_v25 }
 0x142   : > { %v901_v26 = vpop.eup %900 }
 0x143   : > { %819 = vmatmul.mubr.msk.f32.vlgmr.msra.gmra.mrb[2].mxu1 %vm372_vm5, %v901_v26  ;;  %619 = vst.msk [vmem:[%s355_s19] sm:$0xff] %vm372_vm5, %v901_v26 }
 0x144   : > { %973 = shalt.err (!%p970_p9)
}
 0x145   : > { %s974_s9 = scalar_lea.hbm %s1288_s22, 128  ;;  %s978_s14 = scalar_lea.hbm %s1342_s8, 256 }
 0x146   : > { %p975_p2 = scmp.ne.s32.totalorder %s1288_s22, %s974_s9  ;;  %p979_p11 = scmp.lt.u32.totalorder %s1288_s22, %s1342_s8 }
 0x147   : > { %p980_p1 = scmp.lt.u32.totalorder %s978_s14, %s974_s9  ;;  %p982_p6 = scmp.lt.u32.totalorder %s974_s9, %s1288_s22 }
 0x148   : > { %p976_p5 = pnand %p975_p2, %p1177_p12 }
 0x149   : > { %p981_p4 = por %p980_p1, %p979_p11 }
 0x14a   : > { %p977_p0 = pneg %p976_p5 }
 0x14b   : > { %p983_p8 = por %p982_p6, %p981_p4 }
 0x14d   : > { %p984_p10 = pnand %p983_p8, %p977_p0 }
 0x14f   : > { %987 = shalt.err (!%p984_p10)
}
 0x150   : > { %843 = dma.vmem_to_hbm [thread:$0]  (%p1177_p12), %s642_s25, 128, %s1288_s22, %s625_s10   ;;  %v773_v27 = vld [vmem:[%s1340_s6] ss:$0 sm:$0xff]  ;;  %vm617_vm6 = vcmask 64512  }
 0x151   : > { %s363_s20 = scalar_lea.vmem %s1341_s7, %s767_s13 }
 0x216   : > { %v613_v28 = vpop.f32.mrb[2].mxu1 }
 0x217   : > { %v614_v29 = vadd.f32 %v773_v27, %v613_v28  ;;  %v820_v30 = vpop.f32.mrb[3].mxu1 }
 0x219   : > { %618 = vst.msk [vmem:[%s363_s20] sm:$0xff] %vm617_vm6, %v614_v29 }
 0x21a PF: > { %s660_s24 = sand.u32 1, %s1018_s27   ;;  %p1360_p12 = scmp.ne.s32.totalorder %s1349_s12, 0 }
 0x21b   : > { %p1361_p13 = scmp.ge.s32.totalorder %s1030_s30, 2  ;;  %s661_s25 = scalar_lea.sflag [#allocation4], %s660_s24 }
 0x21d   : > { %p854_p3 = pnand %p1361_p13, %p1360_p12 }
 0x21f   : > { %1013 = dma.done.wait (!%p854_p3), %s661_s25, 128  }
 0x220   : > { %1015 = vsyncadd (!%p854_p3), %s661_s25, 4294967168  ;;  %s1362_s30 = sld [smem:[#allocation11_spill]]  ;;  %s1363_s27 = smov %s1022_s28 }
 0x221   : > { %s1364_s28 = smov %s1026_s29  ;;  %s1365_s29 = smov %s1173_s23 }
 0x226   : > { %p23_p7 = scmp.ge.s32.totalorder %s1362_s30, 4  }
 0x228   :  { %25 = sbr.rel (!%p23_p7) target bundleno = 6 (0x6), region = 112 }
 0x22f   :  { %666 = vsyncpa [#allocation3], 1 }
 0x230   :  { %668 = vsyncpa [#allocation3 + $0x1], 1 }
 0x231   :  { %669 = vsyncpa [#allocation6], 1 }
 0x232   :  { %670 = vsyncpa [#allocation4], 1 }
 0x233   :  { %672 = vsyncpa [#allocation4 + $0x1], 1 }

</bundles_post_ra>
